<compile_context>
chip_gen: v6e
topology: v6e:2x2x1
jax: 0.10.0
libtpu: 0.0.40
codegen_flags: <defaults>
</compile_context>

<pallas_src>
import jax
import jax.numpy as jnp
from jax.experimental import pallas as pl
from jax.experimental.pallas import tpu as pltpu


# ---------------------------------------------------------------------------
# small helper: pairwise (tree) max reduction over a list of equal-shape values
# ---------------------------------------------------------------------------
def _tree_max(vals):
    while len(vals) > 1:
        nxt = []
        for i in range(0, len(vals) - 1, 2):
            nxt.append(jnp.maximum(vals[i], vals[i + 1]))
        if len(vals) % 2:
            nxt.append(vals[-1])
        vals = nxt
    return vals[0]


# ---------------------------------------------------------------------------
# Fused forward kernel
# ---------------------------------------------------------------------------
def make_structure_generator(n_layers, i_pts, d_dim, k, branching, d_latent):
    """Builds a fused single-pallas_call forward pass for StructureGenerator.

    # TODO(synk): SelfCorrelation, KMeansConv (iterative k-means clustering) and
    # LocalAdaptiveFeatureAggregation class definitions are absent from the
    # reference source; the feature matrix passes through those stages unchanged
    # and the cluster assignment is a deterministic contiguous split into k
    # clusters (same placeholder semantics as the previous version).
    """
    d = d_dim
    dout = d * branching
    i_final = i_pts + n_layers * k * branching

    # Static divisibility check so the max-pool can never silently drop points.
    i_chk = i_pts
    for _ in range(n_layers):
        assert i_chk % k == 0, f"k={k} must divide point count {i_chk}"
        i_chk += k * branching

    def kernel(latent_ref, w0b0_ref, lp_ref, out_ref):
        # --- StructureGenerator.mlp: latent (N,Dl) @ w0 (Dl,i*d) + b0 (MXU) ---
        latent = latent_ref[...]
        w0 = w0b0_ref[0:d_latent, :]                      # (Dl, i*d)
        b0 = w0b0_ref[d_latent:d_latent + 1, :]           # (1,  i*d)
        slab = jnp.dot(latent, w0,
                       preferred_element_type=jnp.float32) + b0   # (N, i*d)

        # --- Expanding layers: pool -> batched mlp3 -> append (all in vregs) ---
        i_cur = i_pts
        for l in range(n_layers):
            wl = lp_ref[l]                                # (k*d+1, k*dout)
            w_bd = wl[0:k * d, :]                         # block-diag mlp3 weights
            b_t = wl[k * d:k * d + 1, :]                  # bias tiled across clusters
            cs = i_cur // k                               # points per cluster

            # GraphMaxPool: per-cluster tree max over the cs d-wide lane chunks.
            encs = []
            for c in range(k):
                base = c * cs * d
                chunks = [slab[:, base + p * d: base + (p + 1) * d]
                          for p in range(cs)]
                encs.append(_tree_max(chunks))            # (N, d)
            enc = jnp.concatenate(encs, axis=1)           # (N, k*d)

            # UpSampling.mlp3 for ALL k clusters at once: one MXU dot + one bias
            # add (block-diagonal weights make it exactly per-cluster enc @ w3).
            up = jnp.dot(enc, w_bd,
                         preferred_element_type=jnp.float32) + b_t  # (N, k*dout)

            # torch.cat((feature_matrix, upsamples), dim=1) in flat-lane form.
            slab = jnp.concatenate([slab, up], axis=1)
            i_cur += k * branching

        # Single lane-dense, unmasked store of the full (N, i_final*d) slab.
        out_ref[...] = slab.astype(out_ref.dtype)

    def forward(latent, params):
        N = latent.shape[0]
        assert len(params["layers"]) == n_layers

        # ---- parameter packing (pure layout prep, same values): 7 DMAs -> 2 ----
        w0b0 = jnp.concatenate(
            [params["w0"], params["b0"].reshape(1, -1)], axis=0)    # (Dl+1, i*d)
        eye_k = jnp.eye(k, dtype=latent.dtype)
        lp = []
        for lpar in params["layers"]:
            w_bd = jnp.kron(eye_k, lpar["w3"])                      # (k*d, k*dout)
            b_t = jnp.tile(lpar["b3"].reshape(1, -1), (1, k))       # (1,   k*dout)
            lp.append(jnp.concatenate([w_bd, b_t], axis=0))         # (k*d+1, k*dout)
        lp = jnp.stack(lp, axis=0)                                  # (L, k*d+1, k*dout)

        out_flat = pl.pallas_call(
            kernel,
            out_shape=jax.ShapeDtypeStruct((N, i_final * d), latent.dtype),
            in_specs=[pl.BlockSpec(memory_space=pltpu.MemorySpace.VMEM)] * 3,
            out_specs=pl.BlockSpec(memory_space=pltpu.MemorySpace.VMEM),
        )(latent, w0b0, lp)
        return out_flat.reshape(N, i_final, d)

    return forward


# ---------------------------------------------------------------------------
# Pure-JAX reference (same placeholder semantics) for correctness checking
# ---------------------------------------------------------------------------
def reference_forward(latent, params, i_pts, d_dim, k, branching):
    N = latent.shape[0]
    feat = (latent @ params["w0"] + params["b0"]).reshape(N, i_pts, d_dim)
    for lp in params["layers"]:
        I = feat.shape[1]
        cs = I // k
        enc = feat.reshape(N, k, cs, d_dim).max(axis=2)            # GraphMaxPool
        up = (enc.reshape(N * k, d_dim) @ lp["w3"] + lp["b3"])     # mlp3
        up = up.reshape(N, k * branching, d_dim)                   # UpSampling view
        feat = jnp.concatenate([feat, up], axis=1)                 # torch.cat
    return feat


# ---------------------------------------------------------------------------
# Deterministic parameter construction
# ---------------------------------------------------------------------------
def init_params(key, d_latent, i_pts, d_dim, k, branching, n_layers):
    keys = jax.random.split(key, 2 + 2 * n_layers)
    params = {
        # mlp: R^D_latent -> R^(i*d)
        "w0": (jax.random.normal(keys[0], (d_latent, i_pts * d_dim), jnp.float32)
               * (1.0 / jnp.sqrt(d_latent))),
        "b0": jax.random.normal(keys[1], (i_pts * d_dim,), jnp.float32) * 0.01,
        "layers": [],
    }
    for l in range(n_layers):
        # mlp3: R^(C+P) -> R^((C+P)*branching)
        w3 = (jax.random.normal(keys[2 + 2 * l], (d_dim, d_dim * branching),
                                jnp.float32) * (1.0 / jnp.sqrt(d_dim)))
        b3 = jax.random.normal(keys[3 + 2 * l], (d_dim * branching,),
                               jnp.float32) * 0.01
        params["layers"].append({"w3": w3, "b3": b3})
    return params


# ---------------------------------------------------------------------------
if __name__ == "__main__":
    # Small, module-consistent shapes.
    N = 2            # batch
    D_LATENT = 32    # latent vector dimensionality
    I_PTS = 16       # StructureGenerator.i  (initial number of points)
    D_DIM = 8        # StructureGenerator.d  (point dimensionality == C+P)
    K = 4            # clusters per point cloud
    BRANCHING = 2    # children per cluster
    N_LAYERS = 2     # number of expanding layers

    key = jax.random.PRNGKey(0)
    pkey, xkey = jax.random.split(key)
    params = init_params(pkey, D_LATENT, I_PTS, D_DIM, K, BRANCHING, N_LAYERS)
    latent_vector_batch = jax.random.normal(xkey, (N, D_LATENT), jnp.float32)

    fwd = make_structure_generator(N_LAYERS, I_PTS, D_DIM, K, BRANCHING, D_LATENT)
    out = fwd(latent_vector_batch, params)
    out = jax.block_until_ready(out)

    # Expected shape: point growth I -> I + k*branching per layer: 16 -> 24 -> 32.
    assert out.shape == (N, I_PTS + N_LAYERS * K * BRANCHING, D_DIM), out.shape
    assert out.dtype == jnp.float32

    ref = reference_forward(latent_vector_batch, params,
                            I_PTS, D_DIM, K, BRANCHING)
    assert jnp.allclose(out, ref, atol=1e-4, rtol=1e-4), \
        float(jnp.max(jnp.abs(out - ref)))

    print("KERNEL_OK")
</pallas_src>

<mosaic_0001>
module attributes {stable_mosaic.version = 11 : i64} {
  func.func @kernel(%arg0: memref<2x32xf32, #tpu.memory_space<vmem>>, %arg1: memref<33x128xf32, #tpu.memory_space<vmem>>, %arg2: memref<2x33x64xf32, #tpu.memory_space<vmem>>, %arg3: memref<2x256xf32, #tpu.memory_space<vmem>>) attributes {dimension_semantics = [], scalar_prefetch = 0 : i64, scratch_operands = 0 : i64, tpu.core_type = #tpu.core_type<tc>} {
    %c0 = arith.constant 0 : index
    %c0_0 = arith.constant 0 : index
    %0 = vector.load %arg0[%c0, %c0_0] : memref<2x32xf32, #tpu.memory_space<vmem>>, vector<2x32xf32>
    %c0_1 = arith.constant 0 : index
    %c0_2 = arith.constant 0 : index
    %1 = vector.load %arg1[%c0_1, %c0_2] : memref<33x128xf32, #tpu.memory_space<vmem>>, vector<32x128xf32>
    %c32 = arith.constant 32 : index
    %c0_3 = arith.constant 0 : index
    %2 = vector.load %arg1[%c32, %c0_3] : memref<33x128xf32, #tpu.memory_space<vmem>>, vector<1x128xf32>
    %cst = arith.constant dense<0.000000e+00> : vector<2x128xf32>
    %3 = tpu.matmul %0, %1, %cst {dimension_numbers = #tpu.dot_dimension_numbers<[1], [0], [0], [1], [0, 0, 1, 1], [], []>} : vector<2x32xf32>, vector<32x128xf32>, vector<2x128xf32> -> vector<2x128xf32>
    %4 = vector.broadcast %2 : vector<1x128xf32> to vector<2x128xf32>
    %5 = arith.addf %3, %4 : vector<2x128xf32>
    %c0_4 = arith.constant 0 : index
    %c0_5 = arith.constant 0 : index
    %c0_6 = arith.constant 0 : index
    %6 = vector.load %arg2[%c0_4, %c0_5, %c0_6] : memref<2x33x64xf32, #tpu.memory_space<vmem>>, vector<1x33x64xf32>
    %7 = vector.shape_cast %6 : vector<1x33x64xf32> to vector<33x64xf32>
    %8 = vector.extract_strided_slice %7 {offsets = [0, 0], sizes = [32, 64], strides = [1, 1]} : vector<33x64xf32> to vector<32x64xf32>
    %9 = vector.extract_strided_slice %7 {offsets = [32, 0], sizes = [1, 64], strides = [1, 1]} : vector<33x64xf32> to vector<1x64xf32>
    %10 = vector.extract_strided_slice %5 {offsets = [0, 0], sizes = [2, 8], strides = [1, 1]} : vector<2x128xf32> to vector<2x8xf32>
    %11 = vector.extract_strided_slice %5 {offsets = [0, 8], sizes = [2, 8], strides = [1, 1]} : vector<2x128xf32> to vector<2x8xf32>
    %12 = vector.extract_strided_slice %5 {offsets = [0, 16], sizes = [2, 8], strides = [1, 1]} : vector<2x128xf32> to vector<2x8xf32>
    %13 = vector.extract_strided_slice %5 {offsets = [0, 24], sizes = [2, 8], strides = [1, 1]} : vector<2x128xf32> to vector<2x8xf32>
    %14 = arith.maximumf %10, %11 : vector<2x8xf32>
    %15 = arith.maximumf %12, %13 : vector<2x8xf32>
    %16 = arith.maximumf %14, %15 : vector<2x8xf32>
    %17 = vector.extract_strided_slice %5 {offsets = [0, 32], sizes = [2, 8], strides = [1, 1]} : vector<2x128xf32> to vector<2x8xf32>
    %18 = vector.extract_strided_slice %5 {offsets = [0, 40], sizes = [2, 8], strides = [1, 1]} : vector<2x128xf32> to vector<2x8xf32>
    %19 = vector.extract_strided_slice %5 {offsets = [0, 48], sizes = [2, 8], strides = [1, 1]} : vector<2x128xf32> to vector<2x8xf32>
    %20 = vector.extract_strided_slice %5 {offsets = [0, 56], sizes = [2, 8], strides = [1, 1]} : vector<2x128xf32> to vector<2x8xf32>
    %21 = arith.maximumf %17, %18 : vector<2x8xf32>
    %22 = arith.maximumf %19, %20 : vector<2x8xf32>
    %23 = arith.maximumf %21, %22 : vector<2x8xf32>
    %24 = vector.extract_strided_slice %5 {offsets = [0, 64], sizes = [2, 8], strides = [1, 1]} : vector<2x128xf32> to vector<2x8xf32>
    %25 = vector.extract_strided_slice %5 {offsets = [0, 72], sizes = [2, 8], strides = [1, 1]} : vector<2x128xf32> to vector<2x8xf32>
    %26 = vector.extract_strided_slice %5 {offsets = [0, 80], sizes = [2, 8], strides = [1, 1]} : vector<2x128xf32> to vector<2x8xf32>
    %27 = vector.extract_strided_slice %5 {offsets = [0, 88], sizes = [2, 8], strides = [1, 1]} : vector<2x128xf32> to vector<2x8xf32>
    %28 = arith.maximumf %24, %25 : vector<2x8xf32>
    %29 = arith.maximumf %26, %27 : vector<2x8xf32>
    %30 = arith.maximumf %28, %29 : vector<2x8xf32>
    %31 = vector.extract_strided_slice %5 {offsets = [0, 96], sizes = [2, 8], strides = [1, 1]} : vector<2x128xf32> to vector<2x8xf32>
    %32 = vector.extract_strided_slice %5 {offsets = [0, 104], sizes = [2, 8], strides = [1, 1]} : vector<2x128xf32> to vector<2x8xf32>
    %33 = vector.extract_strided_slice %5 {offsets = [0, 112], sizes = [2, 8], strides = [1, 1]} : vector<2x128xf32> to vector<2x8xf32>
    %34 = vector.extract_strided_slice %5 {offsets = [0, 120], sizes = [2, 8], strides = [1, 1]} : vector<2x128xf32> to vector<2x8xf32>
    %35 = arith.maximumf %31, %32 : vector<2x8xf32>
    %36 = arith.maximumf %33, %34 : vector<2x8xf32>
    %37 = arith.maximumf %35, %36 : vector<2x8xf32>
    %38 = tpu.concatenate %16, %23, %30, %37 in 1 : vector<2x8xf32>, vector<2x8xf32>, vector<2x8xf32>, vector<2x8xf32> -> vector<2x32xf32>
    %cst_7 = arith.constant dense<0.000000e+00> : vector<2x64xf32>
    %39 = tpu.matmul %38, %8, %cst_7 {dimension_numbers = #tpu.dot_dimension_numbers<[1], [0], [0], [1], [0, 0, 1, 1], [], []>} : vector<2x32xf32>, vector<32x64xf32>, vector<2x64xf32> -> vector<2x64xf32>
    %40 = vector.broadcast %9 : vector<1x64xf32> to vector<2x64xf32>
    %41 = arith.addf %39, %40 : vector<2x64xf32>
    %42 = tpu.concatenate %5, %41 in 1 : vector<2x128xf32>, vector<2x64xf32> -> vector<2x192xf32>
    %c1 = arith.constant 1 : index
    %c0_8 = arith.constant 0 : index
    %c0_9 = arith.constant 0 : index
    %43 = vector.load %arg2[%c1, %c0_8, %c0_9] : memref<2x33x64xf32, #tpu.memory_space<vmem>>, vector<1x33x64xf32>
    %44 = vector.shape_cast %43 : vector<1x33x64xf32> to vector<33x64xf32>
    %45 = vector.extract_strided_slice %44 {offsets = [0, 0], sizes = [32, 64], strides = [1, 1]} : vector<33x64xf32> to vector<32x64xf32>
    %46 = vector.extract_strided_slice %44 {offsets = [32, 0], sizes = [1, 64], strides = [1, 1]} : vector<33x64xf32> to vector<1x64xf32>
    %47 = vector.extract_strided_slice %42 {offsets = [0, 0], sizes = [2, 8], strides = [1, 1]} : vector<2x192xf32> to vector<2x8xf32>
    %48 = vector.extract_strided_slice %42 {offsets = [0, 8], sizes = [2, 8], strides = [1, 1]} : vector<2x192xf32> to vector<2x8xf32>
    %49 = vector.extract_strided_slice %42 {offsets = [0, 16], sizes = [2, 8], strides = [1, 1]} : vector<2x192xf32> to vector<2x8xf32>
    %50 = vector.extract_strided_slice %42 {offsets = [0, 24], sizes = [2, 8], strides = [1, 1]} : vector<2x192xf32> to vector<2x8xf32>
    %51 = vector.extract_strided_slice %42 {offsets = [0, 32], sizes = [2, 8], strides = [1, 1]} : vector<2x192xf32> to vector<2x8xf32>
    %52 = vector.extract_strided_slice %42 {offsets = [0, 40], sizes = [2, 8], strides = [1, 1]} : vector<2x192xf32> to vector<2x8xf32>
    %53 = arith.maximumf %47, %48 : vector<2x8xf32>
    %54 = arith.maximumf %49, %50 : vector<2x8xf32>
    %55 = arith.maximumf %51, %52 : vector<2x8xf32>
    %56 = arith.maximumf %53, %54 : vector<2x8xf32>
    %57 = arith.maximumf %56, %55 : vector<2x8xf32>
    %58 = vector.extract_strided_slice %42 {offsets = [0, 48], sizes = [2, 8], strides = [1, 1]} : vector<2x192xf32> to vector<2x8xf32>
    %59 = vector.extract_strided_slice %42 {offsets = [0, 56], sizes = [2, 8], strides = [1, 1]} : vector<2x192xf32> to vector<2x8xf32>
    %60 = vector.extract_strided_slice %42 {offsets = [0, 64], sizes = [2, 8], strides = [1, 1]} : vector<2x192xf32> to vector<2x8xf32>
    %61 = vector.extract_strided_slice %42 {offsets = [0, 72], sizes = [2, 8], strides = [1, 1]} : vector<2x192xf32> to vector<2x8xf32>
    %62 = vector.extract_strided_slice %42 {offsets = [0, 80], sizes = [2, 8], strides = [1, 1]} : vector<2x192xf32> to vector<2x8xf32>
    %63 = vector.extract_strided_slice %42 {offsets = [0, 88], sizes = [2, 8], strides = [1, 1]} : vector<2x192xf32> to vector<2x8xf32>
    %64 = arith.maximumf %58, %59 : vector<2x8xf32>
    %65 = arith.maximumf %60, %61 : vector<2x8xf32>
    %66 = arith.maximumf %62, %63 : vector<2x8xf32>
    %67 = arith.maximumf %64, %65 : vector<2x8xf32>
    %68 = arith.maximumf %67, %66 : vector<2x8xf32>
    %69 = vector.extract_strided_slice %42 {offsets = [0, 96], sizes = [2, 8], strides = [1, 1]} : vector<2x192xf32> to vector<2x8xf32>
    %70 = vector.extract_strided_slice %42 {offsets = [0, 104], sizes = [2, 8], strides = [1, 1]} : vector<2x192xf32> to vector<2x8xf32>
    %71 = vector.extract_strided_slice %42 {offsets = [0, 112], sizes = [2, 8], strides = [1, 1]} : vector<2x192xf32> to vector<2x8xf32>
    %72 = vector.extract_strided_slice %42 {offsets = [0, 120], sizes = [2, 8], strides = [1, 1]} : vector<2x192xf32> to vector<2x8xf32>
    %73 = vector.extract_strided_slice %42 {offsets = [0, 128], sizes = [2, 8], strides = [1, 1]} : vector<2x192xf32> to vector<2x8xf32>
    %74 = vector.extract_strided_slice %42 {offsets = [0, 136], sizes = [2, 8], strides = [1, 1]} : vector<2x192xf32> to vector<2x8xf32>
    %75 = arith.maximumf %69, %70 : vector<2x8xf32>
    %76 = arith.maximumf %71, %72 : vector<2x8xf32>
    %77 = arith.maximumf %73, %74 : vector<2x8xf32>
    %78 = arith.maximumf %75, %76 : vector<2x8xf32>
    %79 = arith.maximumf %78, %77 : vector<2x8xf32>
    %80 = vector.extract_strided_slice %42 {offsets = [0, 144], sizes = [2, 8], strides = [1, 1]} : vector<2x192xf32> to vector<2x8xf32>
    %81 = vector.extract_strided_slice %42 {offsets = [0, 152], sizes = [2, 8], strides = [1, 1]} : vector<2x192xf32> to vector<2x8xf32>
    %82 = vector.extract_strided_slice %42 {offsets = [0, 160], sizes = [2, 8], strides = [1, 1]} : vector<2x192xf32> to vector<2x8xf32>
    %83 = vector.extract_strided_slice %42 {offsets = [0, 168], sizes = [2, 8], strides = [1, 1]} : vector<2x192xf32> to vector<2x8xf32>
    %84 = vector.extract_strided_slice %42 {offsets = [0, 176], sizes = [2, 8], strides = [1, 1]} : vector<2x192xf32> to vector<2x8xf32>
    %85 = vector.extract_strided_slice %42 {offsets = [0, 184], sizes = [2, 8], strides = [1, 1]} : vector<2x192xf32> to vector<2x8xf32>
    %86 = arith.maximumf %80, %81 : vector<2x8xf32>
    %87 = arith.maximumf %82, %83 : vector<2x8xf32>
    %88 = arith.maximumf %84, %85 : vector<2x8xf32>
    %89 = arith.maximumf %86, %87 : vector<2x8xf32>
    %90 = arith.maximumf %89, %88 : vector<2x8xf32>
    %91 = tpu.concatenate %57, %68, %79, %90 in 1 : vector<2x8xf32>, vector<2x8xf32>, vector<2x8xf32>, vector<2x8xf32> -> vector<2x32xf32>
    %cst_10 = arith.constant dense<0.000000e+00> : vector<2x64xf32>
    %92 = tpu.matmul %91, %45, %cst_10 {dimension_numbers = #tpu.dot_dimension_numbers<[1], [0], [0], [1], [0, 0, 1, 1], [], []>} : vector<2x32xf32>, vector<32x64xf32>, vector<2x64xf32> -> vector<2x64xf32>
    %93 = vector.broadcast %46 : vector<1x64xf32> to vector<2x64xf32>
    %94 = arith.addf %92, %93 : vector<2x64xf32>
    %95 = tpu.concatenate %42, %94 in 1 : vector<2x192xf32>, vector<2x64xf32> -> vector<2x256xf32>
    %c0_11 = arith.constant 0 : index
    %c0_12 = arith.constant 0 : index
    %96 = vector.load %arg3[%c0_11, %c0_12] : memref<2x256xf32, #tpu.memory_space<vmem>>, vector<2x256xf32>
    tpu.vector_store %arg3[%c0_11, %c0_12], %95 {strides = array<i32>} : memref<2x256xf32, #tpu.memory_space<vmem>>, vector<2x256xf32>,
    return
  }
}

</mosaic_0001>

<bundles_post_ra>
// kernel: tpu_custom_call.1
= control target key start
LH: loop header
LB: loop body
LE: loop exit
PB: predicated region body
PF: predicated region fallthrough
CT: control target
= control target key end

     0   :  { %v450_v1 = vmov 0.0   ;;  %vm451_vm0 = vmmov 0   ;;  %s570_s0 = inlined_call_operand.vmem [shape: f32[2,32], index: 0, kind: input, shape index: {}]   ;;  %s571_s1 = inlined_call_operand.vmem [shape: f32[33,128], index: 1, kind: input, shape index: {}]   ;;  %s572_s2 = inlined_call_operand.vmem [shape: f32[2,33,64], index: 2, kind: input, shape index: {}]   ;;  %s573_s3 = inlined_call_operand.hbm [shape: f32[2,256], index: 3, kind: output, shape index: {}]  }
   0x1   :  { %v19_v0 = vld [vmem:[%s571_s1 + $0x18] sm:$0xff]  ;;  %382 = vmatprep.subr.mxu0 %v450_v1  ;;  %v18_v2 = vld [vmem:[%s571_s1 + $0x10] sm:$0xff]  ;;  %390 = vmatprep.mubr.msk.f32.mxu0 %vm451_vm0, %v450_v1 }
   0x2   :  { %383 = vmatpush3.msra.mxu0 %v19_v0  ;;  %393 = vmatprep.subr.mxu1 %v450_v1 }
   0x3   :  { %8 = vsyncpa [#allocation3], 0  ;;  %384 = vmatprep.subr.mxu0 %v450_v1  ;;  %v17_v3 = vld [vmem:[%s571_s1 + $0x8] sm:$0xff]  ;;  %401 = vmatprep.mubr.msk.f32.mxu1 %vm451_vm0, %v450_v1  ;;  %v16_v4 = vld [vmem:[%s571_s1] sm:$0xff]  ;;  %vm25_vm1 = vcmask 261120   ;;  %s453_s26 = smov 112  }
   0x4   :  { %385 = vmatpush3.msra.mxu0 %v18_v2  ;;  %v15_v5 = vld [vmem:[%s570_s0] sm:$0x3]  ;;  %s452_s0 = smov 120   ;;  %v102_v10 = vld [vmem:[%s572_s2 + $0x18] sm:$0xff]  ;;  %v101_v13 = vld [vmem:[%s572_s2 + $0x10] sm:$0xff]  ;;  %s454_s5 = smov 56  }
   0x5   :  { %386 = vmatprep.subr.mxu0 %v450_v1  ;;  %v355_v6 = vld [vmem:[%s571_s1 + $0x20] ss:$0 sm:$0xff]  ;;  %394 = vmatpush3.msra.mxu1 %v102_v10  ;;  %v100_v14 = vld [vmem:[%s572_s2 + $0x8] sm:$0xff]  ;;  %s455_s6 = smov 104   ;;  %s456_s7 = smov 96   ;;  %vm124_vm2 = vcmask 64512  }
   0x6   :  { %387 = vmatpush3.msra.mxu0 %v17_v3  ;;  %395 = vmatprep.subr.mxu1 %v450_v1  ;;  %v99_v15 = vld [vmem:[%s572_s2] sm:$0xff]  ;;  %s457_s8 = smov 80   ;;  %vm126_vm3 = vcmask 130048   ;;  %vm128_vm4 = vcmask 195584   ;;  %v361_v29 = vld [vmem:[%s572_s2 + $0x38] sm:$0xff]  ;;  %s458_s15 = smov 88  }
   0x7   :  { %388 = vmatprep.subr.mxu0 %v450_v1  ;;  %396 = vmatpush3.msra.mxu1 %v101_v13  ;;  %v357_v24 = vld [vmem:[%s572_s2 + $0x20] ss:$0 sm:$0xff]  ;;  %v360_v34 = vld [vmem:[%s572_s2 + $0x30] sm:$0xff]  ;;  %v359_v35 = vld [vmem:[%s572_s2 + $0x28] sm:$0xff]  ;;  %s459_s20 = smov 48   ;;  %s460_s21 = smov 8  }
   0x8   :  { %389 = vmatpush3.msra.mxu0 %v16_v4  ;;  %397 = vmatprep.subr.mxu1 %v450_v1  ;;  %v362_v28 = vld [vmem:[%s572_s2 + $0x40] sm:$0xff]  ;;  %v364_v47 = vld [vmem:[%s572_s2 + $0x48] ss:$0 sm:$0xff]  ;;  %vm328_vm5 = vcmask 523264   ;;  %s462_s24 = smov [#allocation2]  }
   0x9   :  { %391 = vmatmul.mubr.msk.f32.vlgmr.msra.gmra.mxu0 %vm25_vm1, %v15_v5  ;;  %404 = vmatprep.subr.mxu0 %v450_v1  ;;  %s347_s25 = sshll.u32 %s462_s24, 4  ;;  %s348_s25 = int_to_ptr.vmem [resolvable:$true] %s347_s25 }
   0xa   :  { %412 = vmatprep.mubr.msk.f32.mxu0 %vm451_vm0, %v450_v1  ;;  %398 = vmatpush3.msra.mxu1 %v100_v14  ;;  %p433_p1 = scmp.lt.s32.totalorder %s348_s25, %s348_s25 }
   0xb   :  { %399 = vmatprep.subr.mxu1 %v450_v1  ;;  %405 = vmatpush3.msra.mxu0 %v362_v28 }
   0xc   :  { %400 = vmatpush3.msra.mxu1 %v99_v15  ;;  %406 = vmatprep.subr.mxu0 %v450_v1 }
   0xd   :  { %407 = vmatpush3.msra.mxu0 %v361_v29 }
   0xe   :  { %408 = vmatprep.subr.mxu0 %v450_v1 }
   0xf   :  { %409 = vmatpush3.msra.mxu0 %v360_v34 }
  0x10   :  { %410 = vmatprep.subr.mxu0 %v450_v1 }
  0x11   :  { %411 = vmatpush3.msra.mxu0 %v359_v35 }
  0xc9   :  { %v95_v7 = vpop.f32.mrf.mxu0 }
  0xca   :  { %v514_v8 = vadd.f32 %v355_v6, %v95_v7 }
  0xcb   :  { %v392_v9 = vpop.f32.mrf.mxu0 }
  0xcc   :  { %105 = vrot.lane.b32.xlu0 %v514_v8, %s452_s0 }
 0x13e   :  { %v106_v11 = vpop.permute.xlu0 %105 }
 0x13f   :  { %v108_v12 = vmax.f32 %v514_v8, %v106_v11 }
 0x141   :  { %110 = vrot.lane.b32.xlu0 %v108_v12, %s453_s26 }
 0x1b3   :  { %v111_v16 = vpop.permute.xlu0 %110 }
 0x1b4   :  { %v113_v17 = vmax.f32 %v108_v12, %v111_v16 }
 0x1b6   :  { %121 = vrot.lane.b32.xlu0 %v113_v17, %s454_s5  ;;  %115 = vrot.lane.b32.xlu1 %v113_v17, %s455_s6 }
 0x1ba   :  { %213 = vrot.lane.b32.xlu0 %v108_v12, %s456_s7  ;;  %118 = vrot.lane.b32.xlu1 %v113_v17, %s457_s8 }
 0x228   :  { %v116_v18 = vpop.permute.xlu1 %115  ;;  %v122_v21 = vpop.permute.xlu0 %121 }
 0x229   :  { %v125_v19 = vsel %vm124_vm2, %v113_v17, %v116_v18 }
 0x22c   :  { %v119_v20 = vpop.permute.xlu1 %118  ;;  %v214_v32 = vpop.permute.xlu0 %213 }
 0x22d   :  { %v127_v22 = vsel %vm126_vm3, %v125_v19, %v119_v20  ;;  %v216_v33 = vmax.f32 %v113_v17, %v214_v32 }
 0x22e   :  { %v129_v23 = vsel %vm128_vm4, %v127_v22, %v122_v21 }
 0x22f   :  { %402 = vmatmul.mubr.msk.f32.vlgmr.msra.gmra.mxu1 %vm25_vm1, %v129_v23 }
 0x2ef   :  { %v203_v25 = vpop.f32.mrf.mxu1 }
 0x2f0   :  { %v204_v26 = vadd.f32 %v357_v24, %v203_v25 }
 0x2f1   :  { %v403_v27 = vpop.f32.mrf.mxu1 }
 0x2f2   :  { %218 = vrot.lane.b32.xlu1 %v204_v26, %s452_s0  ;;  %s461_s0 = smov 64  }
 0x364   :  { %v219_v30 = vpop.permute.xlu1 %218 }
 0x365   :  { %v221_v31 = vmax.f32 %v204_v26, %v219_v30 }
 0x367   :  { %223 = vrot.lane.b32.xlu0 %v221_v31, %s456_s7  ;;  %227 = vrot.lane.b32.xlu1 %v221_v31, %s453_s26  ;;  %s428_s26 = scalar_lea.vmem %s348_s25, 64 }
 0x368   :  { %p429_p0 = scmp.ne.s32.totalorder %s348_s25, %s428_s26  ;;  %p434_p2 = scmp.lt.s32.totalorder %s428_s26, %s428_s26 }
 0x36a   :  { %p435_p3 = por %p434_p2, %p433_p1 }
 0x36b   :  { %233 = vrot.lane.b32.xlu1 %v216_v33, %s458_s15 }
 0x36c   :  { %p436_p4 = pnand %p435_p3, %p429_p0 }
 0x3d9   :  { %v224_v36 = vpop.permute.xlu0 %223  ;;  %v228_v37 = vpop.permute.xlu1 %227 }
 0x3da   :  { %v226_v38 = vmax.f32 %v113_v17, %v224_v36  ;;  %v230_v39 = vmax.f32 %v221_v31, %v228_v37 }
 0x3dc   :  { %v231_v40 = vmax.f32 %v230_v39, %v224_v36  ;;  %237 = vrot.lane.b32.xlu0 %v226_v38, %s459_s20 }
 0x3dd   :  { %v234_v41 = vpop.permute.xlu1 %233 }
 0x3de   :  { %241 = vrot.lane.b32.xlu1 %v231_v40, %s460_s21  ;;  %v244_v42 = vsel %vm124_vm2, %v216_v33, %v234_v41 }
 0x44e   :  { %v238_v43 = vpop.permute.xlu0 %237 }
 0x44f   :  { %v245_v44 = vsel %vm126_vm3, %v244_v42, %v238_v43 }
 0x450   :  { %v242_v45 = vpop.permute.xlu1 %241 }
 0x451   :  { %v246_v46 = vsel %vm128_vm4, %v245_v44, %v242_v45 }
 0x452   :  { %413 = vmatmul.mubr.msk.f32.vlgmr.msra.gmra.mxu0 %vm25_vm1, %v246_v46 }
 0x512   :  { %v320_v48 = vpop.f32.mrf.mxu0 }
 0x513   :  { %v321_v49 = vadd.f32 %v364_v47, %v320_v48 }
 0x514   :  { %v414_v50 = vpop.f32.mrf.mxu0 }
 0x515   :  { %325 = vrot.lane.b32.xlu0 %v321_v49, %s461_s0 }
 0x587   :  { %v326_v51 = vpop.permute.xlu0 %325 }
 0x588   :  { %v329_v52 = vsel %vm328_vm5, %v204_v26, %v326_v51 }
 0x589   :  { %v331_v53 = vcombine.low %v514_v8, %v329_v52 }
 0x58b   :  { %366 = vst.sshfl [vmem:[#allocation2] sm:$0x33 pattern:$0x76325410] %v331_v53 }
 0x58c   :  { %439 = shalt.err (!%p436_p4)
}
 0x58d   :  { %350 = dma.vmem_to_hbm [thread:$0]  %s348_s25, 64, %s573_s3, [#allocation3]  }
 0x58e   :  { %448 = dma.done.wait [#allocation3], 64  }
 0x58f   :  { %449 = vsyncadd [#allocation3], 4294967232 }
 0x590   :  { %354 = vsyncpa [#allocation3], 1 }

</bundles_post_ra>
